<compile_context>
chip_gen: v5e
topology: v5e:2x2
jax: 0.10.0
libtpu: 0.0.40
codegen_flags: <defaults>
</compile_context>

<pallas_src>
import math

import jax
import jax.numpy as jnp
from jax.experimental import pallas as pl
from jax.experimental.pallas import tpu as pltpu

_EPS = 1e-5
_LANE = 128


def _round_up(x, m):
    return (x + m - 1) // m * m


def _vmem_limit_bytes():
    """Per-generation VMEM budget: physical capacity minus ~16 MiB compiler headroom."""
    try:
        cap = int(pltpu.get_tpu_info().vmem_capacity_bytes)
    except Exception:
        cap = 64 << 20      # conservative (v7x-sized) fallback
    return max(32 << 20, cap - (16 << 20))


def _make_fused_gcn_kernel(num_layers, residual_flags):
    """Build the grid-less fused kernel for a fixed (static) layer stack."""
    residual_flags = tuple(bool(r) for r in residual_flags)

    def kernel(a_ref,       # (N, N)      bf16  normalized adjacency (resident)
               x0_ref,      # (N, Dp)     f32   lane-padded input node features
               w_ref,       # (L, Dp, Dp) bf16  layer weights
               b_ref,       # (L, 1, Dp)  f32   GraphConv biases
               gamma_ref,   # (L, 1, Dp)  f32   BN weights
               beta_ref,    # (L, 1, Dp)  f32   BN biases
               sn_ref,      # (N, 1)      f32   graph-size norm (1/sqrt(n_g) per node)
               m_ref,       # (G, N)      f32   segment-mean readout matrix
               hg_ref):     # out: (G, Dp) f32
        a = a_ref[...]                                   # bf16, loaded once
        sn = sn_ref[...]                                 # (N, 1) f32
        h = x0_ref[...]                                  # (N, Dp) f32, carried in VMEM

        for l in range(num_layers):                      # fully unrolled layer loop
            x = h
            # GraphConv (norm='both'): h = (A_norm @ x) @ W + b -- bf16 MXU, f32 accum.
            agg = jnp.dot(a, x.astype(jnp.bfloat16),
                          preferred_element_type=jnp.float32)
            hh = jnp.dot(agg.astype(jnp.bfloat16), w_ref[l],
                         preferred_element_type=jnp.float32)
            hh = hh + b_ref[l]

            # Graph-size normalization.
            hh = hh * sn

            # BatchNorm1d, training-mode batch stats over nodes, two-pass variance
            # (avoids E[x^2]-E[x]^2 catastrophic cancellation).
            mean = jnp.mean(hh, axis=0, keepdims=True)
            cent = hh - mean
            var = jnp.mean(cent * cent, axis=0, keepdims=True)
            hh = cent * jax.lax.rsqrt(var + _EPS)
            hh = hh * gamma_ref[l] + beta_ref[l]

            # ReLU.
            hh = jnp.maximum(hh, 0.0)

            # Residual (static: only when in_dim == out_dim); dropout p=0.0 == id.
            if residual_flags[l]:
                hh = x + hh
            h = hh

        # Fused dgl.mean_nodes readout: (G, N) @ (N, Dp), lane-dense (G, Dp) store.
        hg_ref[...] = jnp.dot(m_ref[...], h, preferred_element_type=jnp.float32)

    return kernel


class GCNNet1Pallas:
    """Stack of GCN layers + per-graph mean readout (GCNNet1.forward), fully fused."""

    def __init__(self, in_dim, hidden_dims, key):
        self.in_dim = in_dim
        self.hidden_dims = list(hidden_dims)
        # Lane-pad all feature dims to a multiple of 128; zero padding is exact
        # (stays zero through conv / BN / relu / residual).
        self.dp = _round_up(max([in_dim] + self.hidden_dims), _LANE)

        ws, bs, gs, betas, res_flags = [], [], [], [], []
        self.ref_layers = []      # unpadded params for the pure-JAX reference
        d = in_dim
        for hd in self.hidden_dims:
            key, kw = jax.random.split(key)
            limit = math.sqrt(6.0 / (d + hd))                  # xavier_uniform (GraphConv)
            w = jax.random.uniform(kw, (d, hd), jnp.float32, -limit, limit)
            b = jnp.zeros((1, hd), jnp.float32)
            gamma = jnp.ones((1, hd), jnp.float32)
            beta = jnp.zeros((1, hd), jnp.float32)
            residual = (d == hd)
            self.ref_layers.append((w, b, gamma, beta, residual))

            wp = jnp.zeros((self.dp, self.dp), jnp.float32).at[:d, :hd].set(w)
            bp = jnp.zeros((1, self.dp), jnp.float32)
            gp = jnp.zeros((1, self.dp), jnp.float32).at[:, :hd].set(1.0)
            bep = jnp.zeros((1, self.dp), jnp.float32)
            ws.append(wp); bs.append(bp); gs.append(gp); betas.append(bep)
            res_flags.append(residual)
            d = hd

        num_layers = len(self.hidden_dims)
        self.w = jnp.stack(ws).astype(jnp.bfloat16)             # (L, Dp, Dp) bf16
        self.b = jnp.stack(bs).reshape(num_layers, 1, self.dp)
        self.gamma = jnp.stack(gs).reshape(num_layers, 1, self.dp)
        self.beta = jnp.stack(betas).reshape(num_layers, 1, self.dp)
        self.res_flags = tuple(res_flags)
        self._kernel = _make_fused_gcn_kernel(num_layers, self.res_flags)

    def prepare_inputs(self, a_norm, nodes_feat):
        """One-time per-graph prep, hoisted out of the forward hot path:
        bf16 adjacency + lane-padded f32 input features."""
        a_bf = a_norm.astype(jnp.bfloat16)
        n, d = nodes_feat.shape
        x0 = jnp.zeros((n, self.dp), jnp.float32).at[:, :d].set(nodes_feat)
        return a_bf, x0

    def __call__(self, a_bf, x0, nodes_num_norm_sqrt, mean_mat):
        g = mean_mat.shape[0]
        dp = self.dp

        # Whole-array, single-buffered VMEM residency for every operand (no grid).
        vmem_spec = pl.BlockSpec(memory_space=pltpu.MemorySpace.VMEM)

        hg = pl.pallas_call(
            self._kernel,
            out_shape=jax.ShapeDtypeStruct((g, dp), jnp.float32),
            in_specs=[vmem_spec] * 8,
            out_specs=vmem_spec,
            compiler_params=pltpu.CompilerParams(
                vmem_limit_bytes=_vmem_limit_bytes(),   # per-generation budget
            ),
        )(a_bf, x0, self.w, self.b, self.gamma, self.beta,
          nodes_num_norm_sqrt, mean_mat)

        return hg[:, :self.hidden_dims[-1]]

    # Pure-JAX reference (f32 everywhere) of the original PyTorch/DGL semantics.
    def reference(self, a_norm, nodes_feat, snorm, mean_mat):
        h = nodes_feat
        for (w, b, gamma, beta, residual) in self.ref_layers:
            x_in = h
            hh = a_norm @ h @ w + b
            hh = hh * snorm
            mean = jnp.mean(hh, axis=0, keepdims=True)
            var = jnp.mean((hh - mean) ** 2, axis=0, keepdims=True)
            hh = (hh - mean) * jax.lax.rsqrt(var + _EPS)
            hh = hh * gamma + beta
            hh = jnp.maximum(hh, 0.0)
            if residual:
                hh = x_in + hh
            h = hh
        return mean_mat @ h


def build_batched_graph(key, n_nodes_per_graph):
    """Block-diagonal symmetric adjacency (no self loops) + DGL-style norms."""
    n_total = sum(n_nodes_per_graph)
    a = jnp.zeros((n_total, n_total), jnp.float32)
    offset = 0
    for n in n_nodes_per_graph:
        key, sub = jax.random.split(key)
        blk = jax.random.bernoulli(sub, 0.4, (n, n)).astype(jnp.float32)
        blk = jnp.triu(blk, 1)
        blk = blk + blk.T
        a = a.at[offset:offset + n, offset:offset + n].set(blk)
        offset += n
    # DGL GraphConv norm='both': deg clamped to min 1
    deg = jnp.clip(jnp.sum(a, axis=1), 1.0, None)
    inv_sqrt = 1.0 / jnp.sqrt(deg)
    a_norm = inv_sqrt[:, None] * a * inv_sqrt[None, :]
    # per-node 1/sqrt(num_nodes_of_its_graph)
    snorm = jnp.concatenate(
        [jnp.full((n, 1), 1.0 / math.sqrt(n), jnp.float32) for n in n_nodes_per_graph],
        axis=0)
    # (G, N) segment-mean matrix for dgl.mean_nodes
    rows = []
    offset = 0
    for n in n_nodes_per_graph:
        row = jnp.zeros((n_total,), jnp.float32)
        row = row.at[offset:offset + n].set(1.0 / n)
        rows.append(row)
        offset += n
    mean_mat = jnp.stack(rows, axis=0)
    return a_norm, snorm, mean_mat


if __name__ == "__main__":
    key = jax.random.PRNGKey(0)

    # Small batched graph: 2 graphs with 10 and 6 nodes -> N = 16 total nodes.
    n_nodes_per_graph = [10, 6]
    n_total = sum(n_nodes_per_graph)
    in_dim = 8
    hidden_dims = [32, 32]   # layer 1: 8->32 (no residual), layer 2: 32->32 (residual)

    key, kg, kx, kp = jax.random.split(key, 4)
    a_norm, snorm, mean_mat = build_batched_graph(kg, n_nodes_per_graph)
    nodes_feat = jax.random.normal(kx, (n_total, in_dim), jnp.float32)

    model = GCNNet1Pallas(in_dim, hidden_dims, kp)

    # One-time prep (hoisted out of the forward): bf16 adjacency + lane-padded x0.
    a_bf, x0 = model.prepare_inputs(a_norm, nodes_feat)

    hg = model(a_bf, x0, snorm, mean_mat)
    hg = jax.block_until_ready(hg)

    assert hg.shape == (len(n_nodes_per_graph), hidden_dims[-1])
    assert bool(jnp.all(jnp.isfinite(hg)))

    # Loose correctness check against the f32 reference (kernel matmuls run in bf16).
    hg_ref = model.reference(a_norm, nodes_feat, snorm, mean_mat)
    max_err = float(jnp.max(jnp.abs(hg - hg_ref)))
    assert max_err < 0.25, f"max abs error vs reference too large: {max_err}"

    print("KERNEL_OK")
</pallas_src>

<mosaic_0001>
module attributes {stable_mosaic.version = 11 : i64} {
  func.func @kernel(%arg0: memref<16x16xbf16, #tpu.memory_space<vmem>>, %arg1: memref<16x128xf32, #tpu.memory_space<vmem>>, %arg2: memref<2x128x128xbf16, #tpu.memory_space<vmem>>, %arg3: memref<2x1x128xf32, #tpu.memory_space<vmem>>, %arg4: memref<2x1x128xf32, #tpu.memory_space<vmem>>, %arg5: memref<2x1x128xf32, #tpu.memory_space<vmem>>, %arg6: memref<16x1xf32, #tpu.memory_space<vmem>>, %arg7: memref<2x16xf32, #tpu.memory_space<vmem>>, %arg8: memref<2x128xf32, #tpu.memory_space<vmem>>) attributes {dimension_semantics = [], scalar_prefetch = 0 : i64, scratch_operands = 0 : i64, tpu.core_type = #tpu.core_type<tc>} {
    %c0 = arith.constant 0 : index
    %c0_0 = arith.constant 0 : index
    %0 = vector.load %arg0[%c0, %c0_0] : memref<16x16xbf16, #tpu.memory_space<vmem>>, vector<16x16xbf16>
    %c0_1 = arith.constant 0 : index
    %c0_2 = arith.constant 0 : index
    %1 = vector.load %arg6[%c0_1, %c0_2] : memref<16x1xf32, #tpu.memory_space<vmem>>, vector<16x1xf32>
    %c0_3 = arith.constant 0 : index
    %c0_4 = arith.constant 0 : index
    %2 = vector.load %arg1[%c0_3, %c0_4] : memref<16x128xf32, #tpu.memory_space<vmem>>, vector<16x128xf32>
    %3 = arith.truncf %2 : vector<16x128xf32> to vector<16x128xbf16>
    %cst = arith.constant dense<0.000000e+00> : vector<16x128xf32>
    %4 = tpu.matmul %0, %3, %cst {dimension_numbers = #tpu.dot_dimension_numbers<[1], [0], [0], [1], [0, 0, 1, 1], [], []>} : vector<16x16xbf16>, vector<16x128xbf16>, vector<16x128xf32> -> vector<16x128xf32>
    %5 = arith.truncf %4 : vector<16x128xf32> to vector<16x128xbf16>
    %c0_5 = arith.constant 0 : index
    %c0_6 = arith.constant 0 : index
    %c0_7 = arith.constant 0 : index
    %6 = vector.load %arg2[%c0_5, %c0_6, %c0_7] : memref<2x128x128xbf16, #tpu.memory_space<vmem>>, vector<1x128x128xbf16>
    %7 = vector.shape_cast %6 : vector<1x128x128xbf16> to vector<128x128xbf16>
    %cst_8 = arith.constant dense<0.000000e+00> : vector<16x128xf32>
    %8 = tpu.matmul %5, %7, %cst_8 {dimension_numbers = #tpu.dot_dimension_numbers<[1], [0], [0], [1], [0, 0, 1, 1], [], []>} : vector<16x128xbf16>, vector<128x128xbf16>, vector<16x128xf32> -> vector<16x128xf32>
    %c0_9 = arith.constant 0 : index
    %c0_10 = arith.constant 0 : index
    %c0_11 = arith.constant 0 : index
    %9 = vector.load %arg3[%c0_9, %c0_10, %c0_11] : memref<2x1x128xf32, #tpu.memory_space<vmem>>, vector<1x1x128xf32>
    %10 = vector.shape_cast %9 : vector<1x1x128xf32> to vector<1x128xf32>
    %11 = vector.broadcast %10 : vector<1x128xf32> to vector<16x128xf32>
    %12 = arith.addf %8, %11 : vector<16x128xf32>
    %13 = vector.broadcast %1 : vector<16x1xf32> to vector<16x128xf32>
    %14 = arith.mulf %12, %13 : vector<16x128xf32>
    %cst_12 = arith.constant dense<0.000000e+00> : vector<128xf32>
    %15 = vector.multi_reduction <add>, %14, %cst_12 [0] : vector<16x128xf32> to vector<128xf32>
    %16 = vector.shape_cast %15 : vector<128xf32> to vector<1x128xf32>
    %cst_13 = arith.constant 1.600000e+01 : f32
    %17 = vector.broadcast %cst_13 : f32 to vector<1x128xf32>
    %18 = arith.divf %16, %17 : vector<1x128xf32>
    %19 = vector.broadcast %18 : vector<1x128xf32> to vector<16x128xf32>
    %20 = arith.subf %14, %19 : vector<16x128xf32>
    %21 = arith.mulf %20, %20 : vector<16x128xf32>
    %cst_14 = arith.constant dense<0.000000e+00> : vector<128xf32>
    %22 = vector.multi_reduction <add>, %21, %cst_14 [0] : vector<16x128xf32> to vector<128xf32>
    %23 = vector.shape_cast %22 : vector<128xf32> to vector<1x128xf32>
    %cst_15 = arith.constant 1.600000e+01 : f32
    %24 = vector.broadcast %cst_15 : f32 to vector<1x128xf32>
    %25 = arith.divf %23, %24 : vector<1x128xf32>
    %cst_16 = arith.constant 9.99999974E-6 : f32
    %26 = vector.broadcast %cst_16 : f32 to vector<1x128xf32>
    %27 = arith.addf %25, %26 : vector<1x128xf32>
    %28 = math.rsqrt %27 : vector<1x128xf32>
    %29 = vector.broadcast %28 : vector<1x128xf32> to vector<16x128xf32>
    %30 = arith.mulf %20, %29 : vector<16x128xf32>
    %c0_17 = arith.constant 0 : index
    %c0_18 = arith.constant 0 : index
    %c0_19 = arith.constant 0 : index
    %31 = vector.load %arg4[%c0_17, %c0_18, %c0_19] : memref<2x1x128xf32, #tpu.memory_space<vmem>>, vector<1x1x128xf32>
    %32 = vector.shape_cast %31 : vector<1x1x128xf32> to vector<1x128xf32>
    %33 = vector.broadcast %32 : vector<1x128xf32> to vector<16x128xf32>
    %34 = arith.mulf %30, %33 : vector<16x128xf32>
    %c0_20 = arith.constant 0 : index
    %c0_21 = arith.constant 0 : index
    %c0_22 = arith.constant 0 : index
    %35 = vector.load %arg5[%c0_20, %c0_21, %c0_22] : memref<2x1x128xf32, #tpu.memory_space<vmem>>, vector<1x1x128xf32>
    %36 = vector.shape_cast %35 : vector<1x1x128xf32> to vector<1x128xf32>
    %37 = vector.broadcast %36 : vector<1x128xf32> to vector<16x128xf32>
    %38 = arith.addf %34, %37 : vector<16x128xf32>
    %cst_23 = arith.constant 0.000000e+00 : f32
    %39 = vector.broadcast %cst_23 : f32 to vector<16x128xf32>
    %40 = arith.maximumf %38, %39 : vector<16x128xf32>
    %41 = arith.truncf %40 : vector<16x128xf32> to vector<16x128xbf16>
    %cst_24 = arith.constant dense<0.000000e+00> : vector<16x128xf32>
    %42 = tpu.matmul %0, %41, %cst_24 {dimension_numbers = #tpu.dot_dimension_numbers<[1], [0], [0], [1], [0, 0, 1, 1], [], []>} : vector<16x16xbf16>, vector<16x128xbf16>, vector<16x128xf32> -> vector<16x128xf32>
    %43 = arith.truncf %42 : vector<16x128xf32> to vector<16x128xbf16>
    %c1 = arith.constant 1 : index
    %c0_25 = arith.constant 0 : index
    %c0_26 = arith.constant 0 : index
    %44 = vector.load %arg2[%c1, %c0_25, %c0_26] : memref<2x128x128xbf16, #tpu.memory_space<vmem>>, vector<1x128x128xbf16>
    %45 = vector.shape_cast %44 : vector<1x128x128xbf16> to vector<128x128xbf16>
    %cst_27 = arith.constant dense<0.000000e+00> : vector<16x128xf32>
    %46 = tpu.matmul %43, %45, %cst_27 {dimension_numbers = #tpu.dot_dimension_numbers<[1], [0], [0], [1], [0, 0, 1, 1], [], []>} : vector<16x128xbf16>, vector<128x128xbf16>, vector<16x128xf32> -> vector<16x128xf32>
    %c1_28 = arith.constant 1 : index
    %c0_29 = arith.constant 0 : index
    %c0_30 = arith.constant 0 : index
    %47 = vector.load %arg3[%c1_28, %c0_29, %c0_30] : memref<2x1x128xf32, #tpu.memory_space<vmem>>, vector<1x1x128xf32>
    %48 = vector.shape_cast %47 : vector<1x1x128xf32> to vector<1x128xf32>
    %49 = vector.broadcast %48 : vector<1x128xf32> to vector<16x128xf32>
    %50 = arith.addf %46, %49 : vector<16x128xf32>
    %51 = vector.broadcast %1 : vector<16x1xf32> to vector<16x128xf32>
    %52 = arith.mulf %50, %51 : vector<16x128xf32>
    %cst_31 = arith.constant dense<0.000000e+00> : vector<128xf32>
    %53 = vector.multi_reduction <add>, %52, %cst_31 [0] : vector<16x128xf32> to vector<128xf32>
    %54 = vector.shape_cast %53 : vector<128xf32> to vector<1x128xf32>
    %cst_32 = arith.constant 1.600000e+01 : f32
    %55 = vector.broadcast %cst_32 : f32 to vector<1x128xf32>
    %56 = arith.divf %54, %55 : vector<1x128xf32>
    %57 = vector.broadcast %56 : vector<1x128xf32> to vector<16x128xf32>
    %58 = arith.subf %52, %57 : vector<16x128xf32>
    %59 = arith.mulf %58, %58 : vector<16x128xf32>
    %cst_33 = arith.constant dense<0.000000e+00> : vector<128xf32>
    %60 = vector.multi_reduction <add>, %59, %cst_33 [0] : vector<16x128xf32> to vector<128xf32>
    %61 = vector.shape_cast %60 : vector<128xf32> to vector<1x128xf32>
    %cst_34 = arith.constant 1.600000e+01 : f32
    %62 = vector.broadcast %cst_34 : f32 to vector<1x128xf32>
    %63 = arith.divf %61, %62 : vector<1x128xf32>
    %cst_35 = arith.constant 9.99999974E-6 : f32
    %64 = vector.broadcast %cst_35 : f32 to vector<1x128xf32>
    %65 = arith.addf %63, %64 : vector<1x128xf32>
    %66 = math.rsqrt %65 : vector<1x128xf32>
    %67 = vector.broadcast %66 : vector<1x128xf32> to vector<16x128xf32>
    %68 = arith.mulf %58, %67 : vector<16x128xf32>
    %c1_36 = arith.constant 1 : index
    %c0_37 = arith.constant 0 : index
    %c0_38 = arith.constant 0 : index
    %69 = vector.load %arg4[%c1_36, %c0_37, %c0_38] : memref<2x1x128xf32, #tpu.memory_space<vmem>>, vector<1x1x128xf32>
    %70 = vector.shape_cast %69 : vector<1x1x128xf32> to vector<1x128xf32>
    %71 = vector.broadcast %70 : vector<1x128xf32> to vector<16x128xf32>
    %72 = arith.mulf %68, %71 : vector<16x128xf32>
    %c1_39 = arith.constant 1 : index
    %c0_40 = arith.constant 0 : index
    %c0_41 = arith.constant 0 : index
    %73 = vector.load %arg5[%c1_39, %c0_40, %c0_41] : memref<2x1x128xf32, #tpu.memory_space<vmem>>, vector<1x1x128xf32>
    %74 = vector.shape_cast %73 : vector<1x1x128xf32> to vector<1x128xf32>
    %75 = vector.broadcast %74 : vector<1x128xf32> to vector<16x128xf32>
    %76 = arith.addf %72, %75 : vector<16x128xf32>
    %cst_42 = arith.constant 0.000000e+00 : f32
    %77 = vector.broadcast %cst_42 : f32 to vector<16x128xf32>
    %78 = arith.maximumf %76, %77 : vector<16x128xf32>
    %79 = arith.addf %40, %78 : vector<16x128xf32>
    %c0_43 = arith.constant 0 : index
    %c0_44 = arith.constant 0 : index
    %80 = vector.load %arg7[%c0_43, %c0_44] : memref<2x16xf32, #tpu.memory_space<vmem>>, vector<2x16xf32>
    %cst_45 = arith.constant dense<0.000000e+00> : vector<2x128xf32>
    %81 = tpu.matmul %80, %79, %cst_45 {dimension_numbers = #tpu.dot_dimension_numbers<[1], [0], [0], [1], [0, 0, 1, 1], [], []>} : vector<2x16xf32>, vector<16x128xf32>, vector<2x128xf32> -> vector<2x128xf32>
    %c0_46 = arith.constant 0 : index
    %c0_47 = arith.constant 0 : index
    %82 = vector.load %arg8[%c0_46, %c0_47] : memref<2x128xf32, #tpu.memory_space<vmem>>, vector<2x128xf32>
    tpu.vector_store %arg8[%c0_46, %c0_47], %81 {strides = array<i32>} : memref<2x128xf32, #tpu.memory_space<vmem>>, vector<2x128xf32>,
    return
  }
}

</mosaic_0001>

<bundles_post_ra>
// kernel: tpu_custom_call.1
= control target key start
LH: loop header
LB: loop body
LE: loop exit
PB: predicated region body
PF: predicated region fallthrough
CT: control target
= control target key end

     0   :  { %13 = vsyncpa [#allocation3], 0  ;;  %s838_s0 = inlined_call_operand.hbm [shape: bf16[16,16], index: 0, kind: input, shape index: {}]   ;;  %s839_s1 = inlined_call_operand.vmem [shape: f32[16,128], index: 1, kind: input, shape index: {}]   ;;  %s840_s2 = inlined_call_operand.hbm [shape: bf16[2,128,128], index: 2, kind: input, shape index: {}]   ;;  %s841_s3 = inlined_call_operand.hbm [shape: f32[2,1,128], index: 3, kind: input, shape index: {}]   ;;  %s842_s4 = inlined_call_operand.vmem [shape: f32[2,1,128], index: 4, kind: input, shape index: {}]   ;;  %s843_s5 = inlined_call_operand.hbm [shape: f32[2,1,128], index: 5, kind: input, shape index: {}]   ;;  %s844_s6 = inlined_call_operand.vmem [shape: f32[16,1], index: 6, kind: input, shape index: {}]   ;;  %s845_s7 = inlined_call_operand.vmem [shape: f32[2,16], index: 7, kind: input, shape index: {}]   ;;  %s846_s8 = inlined_call_operand.hbm [shape: f32[2,128], index: 8, kind: output, shape index: {}]  }
   0x1   :  { %14 = vsyncpa [#allocation6], 0 }
   0x2   :  { %15 = vsyncpa [#allocation9], 0 }
   0x3   :  { %16 = vsyncpa [#allocation4], 0  ;;  %s36_s29 = sshll.u32 %s840_s2, 4  ;;  %s711_s30 = smov [#allocation5]   ;;  %s37_s29 = int_to_ptr.hbm [resolvable:$true] %s36_s29 }
   0x4   :  { %s38_s9 = sshll.u32 %s711_s30, 4  ;;  %s21_s12 = sshll.u32 %s838_s0, 4  ;;  %s39_s9 = int_to_ptr.vmem [resolvable:$true] %s38_s9  ;;  %s22_s12 = int_to_ptr.hbm [resolvable:$true] %s21_s12 }
   0x5   :  { %s712_s13 = smov 64   ;;  %s713_s14 = smov 4  }
   0x6   :  { %44 = dma.hbm_to_vmem [thread:$0]  %s37_s29, 2048, %s39_s9, [#allocation6], %s712_s13, %s712_s13, %s713_s14  }
   0x7   :  { %s714_s15 = smov [#allocation2]   ;;  %s49_s19 = sshll.u32 %s841_s3, 4  ;;  %s50_s19 = int_to_ptr.hbm [resolvable:$true] %s49_s19 }
   0x8   :  { %s23_s16 = sshll.u32 %s714_s15, 4  ;;  %s715_s2 = smov [#allocation7]   ;;  %s24_s16 = int_to_ptr.vmem [resolvable:$true] %s23_s16 }
   0x9   :  { %29 = dma.hbm_to_vmem [thread:$0]  %s22_s12, 128, %s24_s16, [#allocation3], %s712_s13, %s712_s13, %s713_s14  }
   0xa   :  { %s51_s20 = sshll.u32 %s715_s2, 4  ;;  %s64_s0 = sshll.u32 %s843_s5, 4  ;;  %s52_s20 = int_to_ptr.vmem [resolvable:$true] %s51_s20  ;;  %s65_s0 = int_to_ptr.hbm [resolvable:$true] %s64_s0 }
   0xb   :  { %s716_s23 = smov 16   ;;  %s717_s24 = smov 1  }
   0xc   :  { %57 = dma.hbm_to_vmem [thread:$0]  %s50_s19, 32, %s52_s20, [#allocation6], %s716_s23, %s716_s23, %s717_s24  }
   0xd   :  { %s718_s25 = smov [#allocation8]  }
   0xe   :  { %s66_s26 = sshll.u32 %s718_s25, 4  ;;  %s67_s26 = int_to_ptr.vmem [resolvable:$true] %s66_s26 }
   0xf   :  { %72 = dma.hbm_to_vmem [thread:$0]  %s65_s0, 32, %s67_s26, [#allocation9], %s716_s23, %s716_s23, %s717_s24  }
  0x10   :  { %703 = dma.done.wait [#allocation3], 128  }
  0x11   :  { %704 = vsyncadd [#allocation3], 4294967168 }
  0x12   :  { %705 = dma.done.wait [#allocation6], 2080  }
  0x13   :  { %706 = vsyncadd [#allocation6], 4294965216 }
  0x14   :  { %707 = dma.done.wait [#allocation9], 32  }
  0x15   :  { %708 = vsyncadd [#allocation9], 4294967264  ;;  %v98_v0 = vld [vmem:[%s839_s1] sm:$0xff]  ;;  %v99_v1 = vld [vmem:[%s839_s1 + $0x8] sm:$0xff]  ;;  %vm106_vm0 = vcmask 130048   ;;  %v719_v13 = vmov 0  }
  0x16   :  { %v100_v2 = vpack.c.bf16 %v99_v1, %v98_v0  ;;  %v550_v3 = vld [vmem:[#allocation5 + $0x38] sm:$0xff]  ;;  %v549_v5 = vld [vmem:[#allocation5 + $0x30] sm:$0xff]  ;;  %v548_v6 = vld [vmem:[#allocation5 + $0x28] sm:$0xff]  ;;  %570 = vset.pattern.permute.xlu0 %v719_v13  ;;  %v720_v18 = vmov 16.0   ;;  %s458_s18 = sshll.u32 %s846_s8, 4  ;;  %s459_s18 = int_to_ptr.hbm [resolvable:$true] %s458_s18 }
  0x17   :  { %v785_v4 = vld [vmem:[#allocation2] sm:$0xff]  ;;  %193 = vmatpush.bf16.msra.mxu1 %v550_v3  ;;  %v547_v7 = vld [vmem:[#allocation5 + $0x20] sm:$0xff]  ;;  %v545_v9 = vld [vmem:[#allocation5 + $0x10] sm:$0xff]  ;;  %577 = vrcp.f32 %v720_v18 }
  0x18   :  { %117 = vmatpush.bf16.msra.mxu0 %v100_v2  ;;  %v546_v8 = vld [vmem:[#allocation5 + $0x18] sm:$0xff]  ;;  %v544_v10 = vld [vmem:[#allocation5 + $0x8] sm:$0xff]  ;;  %v543_v11 = vld [vmem:[#allocation5] sm:$0xff] }
  0x19   :  { %v96_v12 = vld [vmem:[%s844_s6] sm:$0xff]  ;;  %v97_v14 = vld [vmem:[%s844_s6 + $0x8] sm:$0xff]  ;;  %v557_v56 = vld [vmem:[#allocation5 + $0x70] sm:$0xff] }
  0x1a   :  { %209 = vperm.xlu0 %570, %v96_v12   ;;  %v571_v21 = vld [vmem:[#allocation7] ss:$0 sm:$0xff]  ;;  %v558_v55 = vld [vmem:[#allocation5 + $0x78] sm:$0xff]  ;;  %v556_v57 = vld [vmem:[#allocation5 + $0x68] sm:$0xff] }
  0x1b   :  { %474 = vmatmul.msk.bf16.vlgmr.msra.gmra.mxu0 %vm106_vm0, %v785_v4  ;;  %194 = vmatpush.bf16.msra.mxu1 %v549_v5  ;;  %v555_v61 = vld [vmem:[#allocation5 + $0x60] sm:$0xff]  ;;  %v554_v0 = vld [vmem:[#allocation5 + $0x58] sm:$0xff] }
  0x1c   :  { %359 = vmatpush.bf16.msra.mxu3 %v558_v55  ;;  %v572_v2 = vld [vmem:[%s842_s4] ss:$0 sm:$0xff]  ;;  %v575_v55 = vld [vmem:[%s842_s4 + $0x1] ss:$0 sm:$0xff]  ;;  %s721_s4 = smov [#allocation10]  }
  0x1d   :  { %v578_v22 = vpop.eup %577  ;;  %s456_s15 = sshll.u32 %s721_s4, 4  ;;  %s457_s15 = int_to_ptr.vmem [resolvable:$true] %s456_s15 }
  0x1e   :  { %v227_v25 = vmul.f32 16.0, %v578_v22  ;;  %vm231_vm1 = vweird.f32 %v578_v22 }
  0x1f   :  { %195 = vmatpush.bf16.msra.mxu1 %v548_v6 }
  0x20   :  { %v228_v30 = vsub.f32 1.0, %v227_v25  ;;  %360 = vmatpush.bf16.msra.mxu3 %v557_v56 }
  0x22   :  { %214 = vperm.xlu0 %570, %v97_v14   ;;  %v229_v33 = vmul.f32 %v578_v22, %v228_v30 }
  0x23   :  { %196 = vmatpush.bf16.msra.mxu1 %v547_v7  ;;  %v573_v7 = vld [vmem:[#allocation8] ss:$0 sm:$0xff] }
  0x24   :  { %v230_v36 = vadd.f32 %v578_v22, %v229_v33  ;;  %361 = vmatpush.bf16.msra.mxu3 %v556_v57 }
  0x26   :  { %v801_v39 = vsel %vm231_vm1, %v578_v22, %v230_v36 }
  0x27   :  { %197 = vmatpush.bf16.msra.mxu1 %v546_v8 }
  0x28   :  { %362 = vmatpush.bf16.msra.mxu3 %v555_v61 }
  0x2b   :  { %198 = vmatpush.bf16.msra.mxu1 %v545_v9 }
  0x2c   :  { %363 = vmatpush.bf16.msra.mxu3 %v554_v0 }
  0x2f   :  { %199 = vmatpush.bf16.msra.mxu1 %v544_v10 }
  0x33   :  { %200 = vmatpush.bf16.msra.mxu1 %v543_v11 }
  0x8c   :  { %v795_v19 = vpop.permute.xlu0 %209 }
  0x94   :  { %v797_v27 = vpop.permute.xlu0 %214 }
  0x98   :  { %v119_v15 = vpop.f32.mrf.mxu0 }
  0xa0   :  { %v121_v16 = vpop.f32.mrf.mxu0 }
  0xa1   :  { %v124_v17 = vpack.c.bf16 %v121_v16, %v119_v15  ;;  %v553_v15 = vld [vmem:[#allocation5 + $0x50] sm:$0xff]  ;;  %v552_v16 = vld [vmem:[#allocation5 + $0x48] sm:$0xff] }
  0xa2   :  { %364 = vmatpush.bf16.msra.mxu3 %v553_v15 }
  0xa3   :  { %201 = vmatmul.bf16.vlgmr.msra.gmra.mxu1 %v124_v17  ;;  %v551_v17 = vld [vmem:[#allocation5 + $0x40] sm:$0xff] }
  0xa6   :  { %365 = vmatpush.bf16.msra.mxu3 %v552_v16 }
  0xaa   :  { %366 = vmatpush.bf16.msra.mxu3 %v551_v17 }
 0x120   :  { %v202_v20 = vpop.f32.mrf.mxu1 }
 0x121   :  { %v203_v23 = vadd.f32 %v571_v21, %v202_v20 }
 0x123   :  { %v217_v28 = vmul.f32 %v795_v19, %v203_v23  ;;  %v574_v23 = vld [vmem:[#allocation7 + $0x1] ss:$0 sm:$0xff] }
 0x128   :  { %v204_v24 = vpop.f32.mrf.mxu1 }
 0x129   :  { %v205_v26 = vadd.f32 %v571_v21, %v204_v24 }
 0x12b   :  { %v218_v29 = vmul.f32 %v797_v27, %v205_v26 }
 0x12d   :  { %v219_v31 = vadd.f32 %v218_v29, %v217_v28 }
 0x12f   :  { %v220_v32 = vrot.slane %v219_v31, 4 }
 0x131   :  { %v221_v34 = vadd.f32 %v220_v32, %v219_v31 }
 0x133   :  { %v222_v35 = vrot.slane %v221_v34, 2 }
 0x135   :  { %v223_v37 = vadd.f32 %v222_v35, %v221_v34 }
 0x137   :  { %v224_v38 = vrot.slane %v223_v37, 1 }
 0x139   :  { %v225_v40 = vadd.f32 %v224_v38, %v223_v37 }
 0x13b   :  { %v233_v41 = vmul.f32 %v801_v39, %v225_v40 }
 0x13d   :  { %v234_v42 = vsub.f32 %v217_v28, %v233_v41  ;;  %v235_v43 = vsub.f32 %v218_v29, %v233_v41 }
 0x13f   :  { %v236_v44 = vmul.f32 %v234_v42, %v234_v42  ;;  %v237_v45 = vmul.f32 %v235_v43, %v235_v43 }
 0x141   :  { %v238_v46 = vadd.f32 %v237_v45, %v236_v44 }
 0x143   :  { %v239_v47 = vrot.slane %v238_v46, 4 }
 0x145   :  { %v240_v48 = vadd.f32 %v239_v47, %v238_v46 }
 0x147   :  { %v241_v49 = vrot.slane %v240_v48, 2 }
 0x149   :  { %v242_v50 = vadd.f32 %v241_v49, %v240_v48 }
 0x14b   :  { %v243_v51 = vrot.slane %v242_v50, 1 }
 0x14d   :  { %v244_v52 = vadd.f32 %v243_v51, %v242_v50 }
 0x14f   :  { %v245_v53 = vmul.f32 %v244_v52, %v801_v39 }
 0x151   :  { %v246_v54 = vadd.f32 1e-05, %v245_v53 }
 0x153   :  { %579 = vrsqrt.f32 %v246_v54  ;;  %vm253_vm3 = vweird.f32 %v246_v54 }
 0x159   :  { %v580_v58 = vpop.eup %579 }
 0x15a   :  { %v248_v59 = vmul.f32 %v580_v58, %v246_v54  ;;  %vm254_vm2 = vweird.f32 %v580_v58 }
 0x15b   :  { %vm255_vm4 = vmor %vm253_vm3, %vm254_vm2 }
 0x15c   :  { %v249_v60 = vmul.f32 %v580_v58, %v248_v59 }
 0x15e   :  { %v250_v62 = vmul.f32 0.5, %v249_v60 }
 0x160   :  { %v251_v63 = vsub.f32 1.5, %v250_v62 }
 0x162   :  { %v252_v1 = vmul.f32 %v580_v58, %v251_v63 }
 0x164   :  { %v256_v3 = vsel %vm255_vm4, %v580_v58, %v252_v1  ;;  %v576_v58 = vld [vmem:[#allocation8 + $0x1] ss:$0 sm:$0xff] }
 0x165   :  { %v257_v5 = vmul.f32 %v256_v3, %v234_v42  ;;  %v258_v6 = vmul.f32 %v256_v3, %v235_v43  ;;  %v426_v3 = vld [vmem:[%s845_s7] sm:$0x3] }
 0x167   :  { %v263_v8 = vmul.f32 %v572_v2, %v257_v5  ;;  %v264_v9 = vmul.f32 %v572_v2, %v258_v6 }
 0x169   :  { %v808_v10 = vadd.f32 %v573_v7, %v263_v8  ;;  %v810_v11 = vadd.f32 %v573_v7, %v264_v9 }
 0x16b   :  { %v271_v12 = vmax.f32 %v808_v10, 0.0  ;;  %v272_v13 = vmax.f32 %v810_v11, 0.0 }
 0x16d   :  { %v273_v14 = vpack.c.bf16 %v272_v13, %v271_v12 }
 0x16f   :  { %281 = vmatpush.bf16.msra.mxu2 %v273_v14 }
 0x172   :  { %507 = vmatmul.msk.bf16.vlgmr.msra.gmra.mxu2 %vm106_vm0, %v785_v4 }
 0x1f5   :  { %v283_v18 = vpop.f32.mrf.mxu2 }
 0x1fd   :  { %v285_v20 = vpop.f32.mrf.mxu2 }
 0x1fe   :  { %v288_v21 = vpack.c.bf16 %v285_v20, %v283_v18 }
 0x200   :  { %367 = vmatmul.bf16.vlgmr.msra.gmra.mxu3 %v288_v21 }
 0x283   :  { %v368_v22 = vpop.f32.mrf.mxu3 }
 0x284   :  { %v369_v24 = vadd.f32 %v574_v23, %v368_v22 }
 0x286   :  { %v373_v28 = vmul.f32 %v369_v24, %v795_v19 }
 0x28b   :  { %v370_v25 = vpop.f32.mrf.mxu3 }
 0x28c   :  { %v371_v26 = vadd.f32 %v574_v23, %v370_v25 }
 0x28e   :  { %v374_v29 = vmul.f32 %v371_v26, %v797_v27 }
 0x290   :  { %v375_v4 = vadd.f32 %v374_v29, %v373_v28 }
 0x292   :  { %v376_v30 = vrot.slane %v375_v4, 4 }
 0x294   :  { %v377_v31 = vadd.f32 %v376_v30, %v375_v4 }
 0x296   :  { %v378_v32 = vrot.slane %v377_v31, 2 }
 0x298   :  { %v379_v33 = vadd.f32 %v378_v32, %v377_v31 }
 0x29a   :  { %v380_v34 = vrot.slane %v379_v33, 1 }
 0x29c   :  { %v381_v35 = vadd.f32 %v380_v34, %v379_v33 }
 0x29e   :  { %v382_v36 = vmul.f32 %v381_v35, %v801_v39 }
 0x2a0   :  { %v383_v37 = vsub.f32 %v373_v28, %v382_v36  ;;  %v384_v38 = vsub.f32 %v374_v29, %v382_v36 }
 0x2a2   :  { %v385_v40 = vmul.f32 %v383_v37, %v383_v37  ;;  %v386_v41 = vmul.f32 %v384_v38, %v384_v38 }
 0x2a4   :  { %v387_v42 = vadd.f32 %v386_v41, %v385_v40 }
 0x2a6   :  { %v388_v43 = vrot.slane %v387_v42, 4 }
 0x2a8   :  { %v389_v44 = vadd.f32 %v388_v43, %v387_v42 }
 0x2aa   :  { %v390_v45 = vrot.slane %v389_v44, 2 }
 0x2ac   :  { %v391_v19 = vadd.f32 %v390_v45, %v389_v44 }
 0x2ae   :  { %v392_v46 = vrot.slane %v391_v19, 1 }
 0x2b0   :  { %v393_v27 = vadd.f32 %v392_v46, %v391_v19 }
 0x2b2   :  { %v394_v47 = vmul.f32 %v393_v27, %v801_v39 }
 0x2b4   :  { %v395_v48 = vadd.f32 1e-05, %v394_v47 }
 0x2b6   :  { %581 = vrsqrt.f32 %v395_v48  ;;  %vm402_vm6 = vweird.f32 %v395_v48 }
 0x2bc   :  { %v582_v49 = vpop.eup %581 }
 0x2bd   :  { %v397_v50 = vmul.f32 %v582_v49, %v395_v48  ;;  %vm403_vm5 = vweird.f32 %v582_v49 }
 0x2be   :  { %vm404_vm7 = vmor %vm402_vm6, %vm403_vm5 }
 0x2bf   :  { %v398_v51 = vmul.f32 %v582_v49, %v397_v50 }
 0x2c1   :  { %v399_v52 = vmul.f32 0.5, %v398_v51 }
 0x2c3   :  { %v400_v53 = vsub.f32 1.5, %v399_v52 }
 0x2c5   :  { %v401_v54 = vmul.f32 %v582_v49, %v400_v53 }
 0x2c7   :  { %v405_v56 = vsel %vm404_vm7, %v582_v49, %v401_v54 }
 0x2c8   :  { %v407_v57 = vmul.f32 %v405_v56, %v384_v38  ;;  %v406_v59 = vmul.f32 %v405_v56, %v383_v37 }
 0x2ca   :  { %v414_v39 = vmul.f32 %v575_v55, %v407_v57  ;;  %v413_v60 = vmul.f32 %v575_v55, %v406_v59 }
 0x2cc   :  { %v421_v61 = vadd.f32 %v576_v58, %v414_v39  ;;  %v420_v62 = vadd.f32 %v576_v58, %v413_v60 }
 0x2ce   :  { %v423_v63 = vmax.f32 %v421_v61, 0.0  ;;  %v422_v0 = vmax.f32 %v420_v62, 0.0 }
 0x2d0   :  { %v425_v1 = vadd.f32 %v423_v63, %v272_v13  ;;  %v424_v2 = vadd.f32 %v422_v0, %v271_v12 }
 0x2d2   :  { %444 = vmatpush.msrb.mxu0 %v425_v1 }
 0x2d4   :  { %445 = vmatpush.msrb.mxu0 %v424_v2 }
 0x2d5   :  { %541 = vmatmul.msk.f32.vlgmr.msrb.gmra.mxu0 %vm106_vm0, %v426_v3 }
 0x352   :  { %v447_v5 = vpop.f32.mrf.mxu0 }
 0x353   :  { %450 = vst [vmem:[#allocation10] sm:$0x3] %v447_v5 }
 0x354   :  { %461 = dma.vmem_to_hbm [thread:$0]  %s457_s15, 32, %s459_s18, [#allocation4]  }
 0x355   :  { %709 = dma.done.wait [#allocation4], 32  }
 0x356   :  { %710 = vsyncadd [#allocation4], 4294967264 }
 0x357   :  { %466 = vsyncpa [#allocation3], 1 }
 0x358   :  { %467 = vsyncpa [#allocation6], 1 }
 0x359   :  { %468 = vsyncpa [#allocation9], 1 }
 0x35a   :  { %469 = vsyncpa [#allocation4], 1 }

</bundles_post_ra>
